<compile_context>
chip_gen: v7x
topology: tpu7x:2x2x1
jax: 0.10.0
libtpu: 0.0.40
codegen_flags: <defaults>
</compile_context>

<pallas_src>
import functools

import jax
import jax.numpy as jnp
import numpy as np
from jax.experimental import pallas as pl
from jax.experimental.pallas import tpu as pltpu


# --------------------------------------------------------------------------- #
# In-kernel helpers
# --------------------------------------------------------------------------- #
def _shift_right_1(x, lmask):
    """Shift x one lane toward higher indices; row-start lanes are zeroed by
    lmask (conv left padding).  Explicit concatenate -> direction-unambiguous."""
    t_w = x.shape[-1]
    shifted = jnp.concatenate([jnp.zeros_like(x[:, :1]), x[:, : t_w - 1]], axis=1)
    return shifted * lmask


def _block_pool_conv(xb, halo, wcat, lmask, c_in, th, wo):
    """Pool + conv for one row-block grid step (rows folded onto lanes).

    xb   : (4*C_in, th*Wo) f32 -- s2d rows [i*th, i*th+th), lanes = (r, wo).
    halo : (4*C_in, Wo)    f32 -- s2d row i*th - 1 (zeros for the first block).
    wcat : (C_out, 16*C_in) f32 -- the 3x3/s2 conv as one matrix (taps on K).
    lmask: (1, th*Wo)      f32 -- 0 at lanes r*Wo (left pad), 1 elsewhere.
    Returns pool (C_in, th*Wo) and conv (C_out, th*Wo), both f32.
    """
    t_w = th * wo
    b1 = xb                                                   # bottom rows, col wo
    if th == 1:
        t1 = halo                                             # top rows,    col wo
    else:
        t1 = jnp.concatenate([halo, xb[:, : t_w - wo]], axis=1)
    b0 = _shift_right_1(b1, lmask)                            # bottom rows, col wo-1
    t0 = _shift_right_1(t1, lmask)                            # top rows,    col wo-1

    # Single MXU matmul: K = 16*C_in, N = th*Wo.
    operand = jnp.concatenate([t0, t1, b0, b1], axis=0)       # (16*C_in, th*Wo)
    conv = jnp.dot(wcat, operand, preferred_element_type=jnp.float32)

    # 2x2 max-pool = max over the four sub-pixel channel groups of b1 (VPU).
    c = c_in
    pool = jnp.maximum(jnp.maximum(b1[0:c], b1[c:2 * c]),
                       jnp.maximum(b1[2 * c:3 * c], b1[3 * c:4 * c]))
    return pool, conv


def _stats_kernel(c_in, c_out, th, wo, x_ref, w_ref, m_ref, stat_ref, carry_ref):
    """Pass 1: per-block per-channel sum / sum-of-squares of the pre-BN features."""
    @pl.when(pl.program_id(1) == 0)
    def _():
        carry_ref[...] = jnp.zeros_like(carry_ref)            # top padding row

    xb = x_ref[0, 0].astype(jnp.float32)                      # (4*C_in, th*Wo)
    halo = carry_ref[...]                                     # (4*C_in, Wo)
    pool, conv = _block_pool_conv(xb, halo, w_ref[...], m_ref[...], c_in, th, wo)
    carry_ref[...] = xb[:, (th - 1) * wo:]                    # halo for next block

    stat_ref[0, 0, 0:c_in, :] = jnp.concatenate(
        [jnp.sum(pool, axis=1, keepdims=True),
         jnp.sum(pool * pool, axis=1, keepdims=True)], axis=1)
    stat_ref[0, 0, c_in:c_in + c_out, :] = jnp.concatenate(
        [jnp.sum(conv, axis=1, keepdims=True),
         jnp.sum(conv * conv, axis=1, keepdims=True)], axis=1)


def _apply_kernel(c_in, c_out, th, wo, x_ref, w_ref, m_ref, sc_ref, sh_ref, al_ref,
                  out_ref, carry_ref):
    """Pass 2: recompute pool/conv, apply fused BN (scale/shift) + PReLU, write
    the concatenated channels (pool channels then conv channels) lane-dense."""
    @pl.when(pl.program_id(1) == 0)
    def _():
        carry_ref[...] = jnp.zeros_like(carry_ref)

    xb = x_ref[0, 0].astype(jnp.float32)
    halo = carry_ref[...]
    pool, conv = _block_pool_conv(xb, halo, w_ref[...], m_ref[...], c_in, th, wo)
    carry_ref[...] = xb[:, (th - 1) * wo:]

    sc = sc_ref[...]                                          # (C_total, 1)
    sh = sh_ref[...]
    al = al_ref[...]
    zp = pool * sc[0:c_in] + sh[0:c_in]
    zc = conv * sc[c_in:] + sh[c_in:]
    out_ref[0, 0, 0:c_in, :] = jnp.where(zp > 0, zp, al[0:c_in] * zp)
    out_ref[0, 0, c_in:c_in + c_out, :] = jnp.where(zc > 0, zc, al[c_in:] * zc)


# --------------------------------------------------------------------------- #
# Host-side helpers
# --------------------------------------------------------------------------- #
def _conv_as_matrix(w_oihw, c_in, c_out):
    """(C_out, C_in, 3, 3) -> (C_out, 16*C_in): the 3x3/stride-2/pad-1 conv as one
    MXU matrix.  K layout matches the in-kernel operand stack [T0, T1, B0, B1],
    each slab holding the 4 space-to-depth sub-pixel groups (sh, sw) at
    [(2*sh+sw)*C_in : (2*sh+sw+1)*C_in].
      T0 = top s2d row (ho-1), col wo-1     T1 = top row,    col wo
      B0 = bottom s2d row (ho), col wo-1    B1 = bottom row, col wo
    """
    w = w_oihw.astype(jnp.float32)
    c = c_in
    slab = {"T0": 0, "T1": 4 * c, "B0": 8 * c, "B1": 12 * c}

    def grp(sh, sw):
        return (2 * sh + sw) * c

    # (slab, sh, sw, kh, kw) for each of the 9 taps (kh = dh+1, kw = dw+1).
    taps = [
        ("T0", 1, 1, 0, 0),  # (dh=-1, dw=-1)
        ("T1", 1, 0, 0, 1),  # (dh=-1, dw= 0)
        ("T1", 1, 1, 0, 2),  # (dh=-1, dw=+1)
        ("B0", 0, 1, 1, 0),  # (dh= 0, dw=-1)
        ("B1", 0, 0, 1, 1),  # (dh= 0, dw= 0)
        ("B1", 0, 1, 1, 2),  # (dh= 0, dw=+1)
        ("B0", 1, 1, 2, 0),  # (dh=+1, dw=-1)
        ("B1", 1, 0, 2, 1),  # (dh=+1, dw= 0)
        ("B1", 1, 1, 2, 2),  # (dh=+1, dw=+1)
    ]
    wc = jnp.zeros((c_out, 16 * c), jnp.float32)
    for name, sh, sw, kh, kw in taps:
        off = slab[name] + grp(sh, sw)
        wc = wc.at[:, off:off + c].set(w[:, :, kh, kw])
    return wc


def _pick_row_block(h_out, w_out, c_in, stream_bytes, target_bytes=2 << 20):
    """Largest divisor of Ho whose input block stays under ~target_bytes.
    Bigger blocks amortize the ~0.35us/step pipeline overhead and lengthen DMAs,
    while the ~2 MiB target keeps the double-buffered working set comfortably
    inside v7x's 64 MiB VMEM (v5e/v6e have 128 MiB and simply enjoy the slack)."""
    best = 1
    for t in range(1, h_out + 1):
        if h_out % t:
            continue
        if 4 * c_in * t * w_out * stream_bytes <= target_bytes:
            best = t
    return best


def downsampler_forward(x_nchw, w_oihw, gamma, beta, alpha, *, eps=1e-3,
                        row_block=None, stream_dtype=jnp.bfloat16):
    """x_nchw: (N, C_in, H, W); w_oihw: (C_out, C_in, 3, 3);
    gamma/beta/alpha: (C_in + C_out,).  Returns (N, C_in + C_out, H//2, W//2)."""
    N, C_in, H, W = x_nchw.shape
    C_out = w_oihw.shape[0]
    assert H % 2 == 0 and W % 2 == 0, "even spatial dims required"
    Ho, Wo = H // 2, W // 2
    C_total = C_in + C_out

    stream_bytes = jnp.dtype(stream_dtype).itemsize
    th = _pick_row_block(Ho, Wo, C_in, stream_bytes) if row_block is None else row_block
    assert Ho % th == 0, "row_block must divide H//2"
    n_blk = Ho // th
    tW = th * Wo

    # ---- single relayout: space-to-depth + rows folded onto lanes, bf16 stream.
    # xs[n, i, (2*sh+sw)*C_in + c, r*Wo + wo] = x[n, c, 2*(i*th+r)+sh, 2*wo+sw]
    xr = x_nchw.reshape(N, C_in, n_blk, th, 2, Wo, 2)
    xs = jnp.transpose(xr, (0, 2, 4, 6, 1, 3, 5)).reshape(N, n_blk, 4 * C_in, tW)
    xs = xs.astype(stream_dtype)

    wcat = _conv_as_matrix(w_oihw, C_in, C_out)                 # (C_out, 16*C_in) f32
    lmask = (jnp.arange(tW) % Wo != 0).astype(jnp.float32).reshape(1, tW)

    # ---- block specs shared by both passes ----------------------------------
    x_spec = pl.BlockSpec((1, 1, 4 * C_in, tW), lambda n, i: (n, i, 0, 0))
    w_spec = pl.BlockSpec((C_out, 16 * C_in), lambda n, i: (0, 0))
    m_spec = pl.BlockSpec((1, tW), lambda n, i: (0, 0))
    vec_spec = pl.BlockSpec((C_total, 1), lambda n, i: (0, 0))
    cparams = pltpu.CompilerParams(
        # batch axis megacore-parallel; row-block axis sequential (halo carry).
        dimension_semantics=("parallel", "arbitrary"),
        vmem_limit_bytes=48 * 1024 * 1024)

    # ---- pass 1: per-block per-channel sum / sum-of-squares -----------------
    pstats = pl.pallas_call(
        functools.partial(_stats_kernel, C_in, C_out, th, Wo),
        grid=(N, n_blk),
        in_specs=[x_spec, w_spec, m_spec],
        out_specs=pl.BlockSpec((1, 1, C_total, 2), lambda n, i: (n, i, 0, 0)),
        out_shape=jax.ShapeDtypeStruct((N, n_blk, C_total, 2), jnp.float32),
        scratch_shapes=[pltpu.VMEM((4 * C_in, Wo), jnp.float32)],
        compiler_params=cparams,
    )(xs, wcat, lmask)

    # ---- tiny XLA finalize: batch mean/var -> fused BN scale/shift -----------
    tot = jnp.sum(pstats, axis=(0, 1))                          # (C_total, 2)
    cnt = jnp.float32(N * Ho * Wo)
    mean = tot[:, 0] / cnt
    # E[x^2] - E[x]^2 in f32 (clamped).  Fine at these scales; switch to a
    # centered second pass if tolerances ever tighten.
    var = jnp.maximum(tot[:, 1] / cnt - mean * mean, 0.0)       # biased (train-mode BN)
    scale = gamma.astype(jnp.float32) * jax.lax.rsqrt(var + eps)
    shift = beta.astype(jnp.float32) - mean * scale
    scale_c = scale.reshape(C_total, 1)
    shift_c = shift.reshape(C_total, 1)
    alpha_c = alpha.astype(jnp.float32).reshape(C_total, 1)

    # ---- pass 2: recompute pool/conv, fused BN + PReLU, lane-dense output ----
    y = pl.pallas_call(
        functools.partial(_apply_kernel, C_in, C_out, th, Wo),
        grid=(N, n_blk),
        in_specs=[x_spec, w_spec, m_spec, vec_spec, vec_spec, vec_spec],
        out_specs=pl.BlockSpec((1, 1, C_total, tW), lambda n, i: (n, i, 0, 0)),
        out_shape=jax.ShapeDtypeStruct((N, n_blk, C_total, tW), jnp.float32),
        scratch_shapes=[pltpu.VMEM((4 * C_in, Wo), jnp.float32)],
        compiler_params=cparams,
    )(xs, wcat, lmask, scale_c, shift_c, alpha_c)

    # Consumer is NCHW (PyTorch semantics): one transpose pass to unfold rows.
    y = y.reshape(N, n_blk, C_total, th, Wo)
    return jnp.transpose(y, (0, 2, 1, 3, 4)).reshape(N, C_total, Ho, Wo)


# --------------------------------------------------------------------------- #
# Pure-JAX reference + self-test
# --------------------------------------------------------------------------- #
def _reference(x, w, gamma, beta, alpha, eps=1e-3):
    """Pure-JAX reference of the PyTorch forward (NCHW, train-mode BN)."""
    pool = jax.lax.reduce_window(x, -jnp.inf, jax.lax.max,
                                 (1, 1, 2, 2), (1, 1, 2, 2), "VALID")
    conv = jax.lax.conv_general_dilated(x, w, (2, 2), ((1, 1), (1, 1)),
                                        dimension_numbers=("NCHW", "OIHW", "NCHW"))
    y = jnp.concatenate([pool, conv], axis=1)
    mean = jnp.mean(y, axis=(0, 2, 3), keepdims=True)
    var = jnp.mean(jnp.square(y - mean), axis=(0, 2, 3), keepdims=True)
    z = (y - mean) * jax.lax.rsqrt(var + eps) * gamma.reshape(1, -1, 1, 1) \
        + beta.reshape(1, -1, 1, 1)
    return jnp.where(z > 0, z, alpha.reshape(1, -1, 1, 1) * z)


if __name__ == "__main__":
    N, C_in, C_out, H, W = 2, 4, 8, 32, 32
    C_total = C_in + C_out

    key = jax.random.PRNGKey(0)
    k1, k2, k3, k4, k5 = jax.random.split(key, 5)

    x = jax.random.normal(k1, (N, C_in, H, W), jnp.float32)
    # Conv2d(in, out, 3, stride=2, pad=1, bias=False): weight (C_out, C_in, 3, 3)
    w = jax.random.normal(k2, (C_out, C_in, 3, 3), jnp.float32) / jnp.sqrt(C_in * 9.0)
    # BN / PReLU over the concatenated (C_in + C_out) channels.
    gamma = 1.0 + 0.1 * jax.random.normal(k3, (C_total,), jnp.float32)
    beta = 0.1 * jax.random.normal(k4, (C_total,), jnp.float32)
    alpha = 0.25 + 0.05 * jax.random.normal(k5, (C_total,), jnp.float32)

    # row_block=8 -> grid (2, 2): exercises the sequential row axis and the
    # cross-block halo carry; th*Wo = 128 keeps the lane axis dense.
    fwd = jax.jit(functools.partial(downsampler_forward, row_block=8))
    out = jax.block_until_ready(fwd(x, w, gamma, beta, alpha))
    assert out.shape == (N, C_total, H // 2, W // 2)

    ref = jax.block_until_ready(_reference(x, w, gamma, beta, alpha))
    # Tolerance accounts for the bf16 HBM stream (inputs quantized to bf16).
    np.testing.assert_allclose(np.asarray(out), np.asarray(ref), rtol=3e-2, atol=3e-2)

    print("KERNEL_OK")
</pallas_src>

<mosaic_0001>
module attributes {stable_mosaic.version = 11 : i64} {
  func.func @_stats_kernel(%arg0: i32, %arg1: i32, %arg2: memref<1x1x16x128xbf16, #tpu.memory_space<vmem>>, %arg3: memref<8x64xf32, #tpu.memory_space<vmem>>, %arg4: memref<1x128xf32, #tpu.memory_space<vmem>>, %arg5: memref<1x1x12x2xf32, #tpu.memory_space<vmem>>, %arg6: memref<16x16xf32, #tpu.memory_space<vmem>>) attributes {dimension_semantics = [#tpu.dimension_semantics<parallel>, #tpu.dimension_semantics<arbitrary>], iteration_bounds = array<i64: 2, 2>, scalar_prefetch = 0 : i64, scratch_operands = 1 : i64, tpu.core_type = #tpu.core_type<tc>, window_params = [{transform_indices = @transform_0, window_bounds = array<i64: 1, 1, 16, 128>}, {pipeline_mode = #tpu.pipeline_mode<synchronous>, transform_indices = @transform_1, window_bounds = array<i64: 8, 64>}, {pipeline_mode = #tpu.pipeline_mode<synchronous>, transform_indices = @transform_2, window_bounds = array<i64: 1, 128>}, {transform_indices = @transform_3, window_bounds = array<i64: 1, 1, 12, 2>}]} {
    %c0_i32 = arith.constant 0 : i32
    %0 = arith.cmpi eq, %arg1, %c0_i32 : i32
    %1 = arith.extui %0 : i1 to i32
    %c0_i32_0 = arith.constant 0 : i32
    %2 = arith.cmpi ne, %1, %c0_i32_0 : i32
    scf.if %2 {
      %cst_25 = arith.constant 0.000000e+00 : f32
      %50 = vector.broadcast %cst_25 : f32 to vector<16x16xf32>
      %c0_26 = arith.constant 0 : index
      %c0_27 = arith.constant 0 : index
      %51 = vector.load %arg6[%c0_26, %c0_27] : memref<16x16xf32, #tpu.memory_space<vmem>>, vector<16x16xf32>
      tpu.vector_store %arg6[%c0_26, %c0_27], %50 {strides = array<i32>} : memref<16x16xf32, #tpu.memory_space<vmem>>, vector<16x16xf32>,
    } else {
    }
    %c0 = arith.constant 0 : index
    %c0_1 = arith.constant 0 : index
    %c0_2 = arith.constant 0 : index
    %c0_3 = arith.constant 0 : index
    %3 = vector.load %arg2[%c0, %c0_1, %c0_2, %c0_3] : memref<1x1x16x128xbf16, #tpu.memory_space<vmem>>, vector<1x1x16x128xbf16>
    %4 = vector.shape_cast %3 : vector<1x1x16x128xbf16> to vector<16x128xbf16>
    %5 = arith.extf %4 : vector<16x128xbf16> to vector<16x128xf32>
    %c0_4 = arith.constant 0 : index
    %c0_5 = arith.constant 0 : index
    %6 = vector.load %arg6[%c0_4, %c0_5] : memref<16x16xf32, #tpu.memory_space<vmem>>, vector<16x16xf32>
    %c0_6 = arith.constant 0 : index
    %c0_7 = arith.constant 0 : index
    %7 = vector.load %arg3[%c0_6, %c0_7] : memref<8x64xf32, #tpu.memory_space<vmem>>, vector<8x64xf32>
    %c0_8 = arith.constant 0 : index
    %c0_9 = arith.constant 0 : index
    %8 = vector.load %arg4[%c0_8, %c0_9] : memref<1x128xf32, #tpu.memory_space<vmem>>, vector<1x128xf32>
    %9 = vector.extract_strided_slice %5 {offsets = [0, 0], sizes = [16, 112], strides = [1, 1]} : vector<16x128xf32> to vector<16x112xf32>
    %10 = tpu.concatenate %6, %9 in 1 : vector<16x16xf32>, vector<16x112xf32> -> vector<16x128xf32>
    %cst = arith.constant 0.000000e+00 : f32
    %11 = vector.broadcast %cst : f32 to vector<16x1xf32>
    %12 = vector.extract_strided_slice %5 {offsets = [0, 0], sizes = [16, 127], strides = [1, 1]} : vector<16x128xf32> to vector<16x127xf32>
    %13 = tpu.concatenate %11, %12 in 1 : vector<16x1xf32>, vector<16x127xf32> -> vector<16x128xf32>
    %14 = vector.broadcast %8 : vector<1x128xf32> to vector<16x128xf32>
    %15 = arith.mulf %13, %14 : vector<16x128xf32>
    %cst_10 = arith.constant 0.000000e+00 : f32
    %16 = vector.broadcast %cst_10 : f32 to vector<16x1xf32>
    %17 = vector.extract_strided_slice %10 {offsets = [0, 0], sizes = [16, 127], strides = [1, 1]} : vector<16x128xf32> to vector<16x127xf32>
    %18 = tpu.concatenate %16, %17 in 1 : vector<16x1xf32>, vector<16x127xf32> -> vector<16x128xf32>
    %19 = vector.broadcast %8 : vector<1x128xf32> to vector<16x128xf32>
    %20 = arith.mulf %18, %19 : vector<16x128xf32>
    %21 = tpu.concatenate %20, %10, %15, %5 in 0 : vector<16x128xf32>, vector<16x128xf32>, vector<16x128xf32>, vector<16x128xf32> -> vector<64x128xf32>
    %cst_11 = arith.constant dense<0.000000e+00> : vector<8x128xf32>
    %22 = tpu.matmul %7, %21, %cst_11 {dimension_numbers = #tpu.dot_dimension_numbers<[1], [0], [0], [1], [0, 0, 1, 1], [], []>} : vector<8x64xf32>, vector<64x128xf32>, vector<8x128xf32> -> vector<8x128xf32>
    %23 = vector.extract_strided_slice %5 {offsets = [0, 0], sizes = [4, 128], strides = [1, 1]} : vector<16x128xf32> to vector<4x128xf32>
    %24 = vector.extract_strided_slice %5 {offsets = [4, 0], sizes = [4, 128], strides = [1, 1]} : vector<16x128xf32> to vector<4x128xf32>
    %25 = arith.maximumf %23, %24 : vector<4x128xf32>
    %26 = vector.extract_strided_slice %5 {offsets = [8, 0], sizes = [4, 128], strides = [1, 1]} : vector<16x128xf32> to vector<4x128xf32>
    %27 = vector.extract_strided_slice %5 {offsets = [12, 0], sizes = [4, 128], strides = [1, 1]} : vector<16x128xf32> to vector<4x128xf32>
    %28 = arith.maximumf %26, %27 : vector<4x128xf32>
    %29 = arith.maximumf %25, %28 : vector<4x128xf32>
    %30 = vector.extract_strided_slice %5 {offsets = [0, 112], sizes = [16, 16], strides = [1, 1]} : vector<16x128xf32> to vector<16x16xf32>
    %c0_12 = arith.constant 0 : index
    %c0_13 = arith.constant 0 : index
    %31 = vector.load %arg6[%c0_12, %c0_13] : memref<16x16xf32, #tpu.memory_space<vmem>>, vector<16x16xf32>
    tpu.vector_store %arg6[%c0_12, %c0_13], %30 {strides = array<i32>} : memref<16x16xf32, #tpu.memory_space<vmem>>, vector<16x16xf32>,
    %cst_14 = arith.constant dense<0.000000e+00> : vector<4xf32>
    %32 = vector.multi_reduction <add>, %29, %cst_14 [1] : vector<4x128xf32> to vector<4xf32>
    %33 = vector.shape_cast %32 : vector<4xf32> to vector<4x1xf32>
    %34 = arith.mulf %29, %29 : vector<4x128xf32>
    %cst_15 = arith.constant dense<0.000000e+00> : vector<4xf32>
    %35 = vector.multi_reduction <add>, %34, %cst_15 [1] : vector<4x128xf32> to vector<4xf32>
    %36 = vector.shape_cast %35 : vector<4xf32> to vector<4x1xf32>
    %37 = tpu.concatenate %33, %36 in 1 : vector<4x1xf32>, vector<4x1xf32> -> vector<4x2xf32>
    %c0_16 = arith.constant 0 : index
    %c0_17 = arith.constant 0 : index
    %c0_18 = arith.constant 0 : index
    %c0_19 = arith.constant 0 : index
    %38 = vector.load %arg5[%c0_16, %c0_17, %c0_18, %c0_19] : memref<1x1x12x2xf32, #tpu.memory_space<vmem>>, vector<1x1x4x2xf32>
    %39 = vector.shape_cast %38 : vector<1x1x4x2xf32> to vector<4x2xf32>
    %40 = vector.shape_cast %37 : vector<4x2xf32> to vector<1x1x4x2xf32>
    tpu.vector_store %arg5[%c0_16, %c0_17, %c0_18, %c0_19], %40 {strides = array<i32>} : memref<1x1x12x2xf32, #tpu.memory_space<vmem>>, vector<1x1x4x2xf32>,
    %cst_20 = arith.constant dense<0.000000e+00> : vector<8xf32>
    %41 = vector.multi_reduction <add>, %22, %cst_20 [1] : vector<8x128xf32> to vector<8xf32>
    %42 = vector.shape_cast %41 : vector<8xf32> to vector<8x1xf32>
    %43 = arith.mulf %22, %22 : vector<8x128xf32>
    %cst_21 = arith.constant dense<0.000000e+00> : vector<8xf32>
    %44 = vector.multi_reduction <add>, %43, %cst_21 [1] : vector<8x128xf32> to vector<8xf32>
    %45 = vector.shape_cast %44 : vector<8xf32> to vector<8x1xf32>
    %46 = tpu.concatenate %42, %45 in 1 : vector<8x1xf32>, vector<8x1xf32> -> vector<8x2xf32>
    %c0_22 = arith.constant 0 : index
    %c0_23 = arith.constant 0 : index
    %c4 = arith.constant 4 : index
    %c0_24 = arith.constant 0 : index
    %47 = vector.load %arg5[%c0_22, %c0_23, %c4, %c0_24] : memref<1x1x12x2xf32, #tpu.memory_space<vmem>>, vector<1x1x8x2xf32>
    %48 = vector.shape_cast %47 : vector<1x1x8x2xf32> to vector<8x2xf32>
    %49 = vector.shape_cast %46 : vector<8x2xf32> to vector<1x1x8x2xf32>
    tpu.vector_store %arg5[%c0_22, %c0_23, %c4, %c0_24], %49 {strides = array<i32>} : memref<1x1x12x2xf32, #tpu.memory_space<vmem>>, vector<1x1x8x2xf32>,
    return
  }
  func.func @transform_0(%arg0: i32, %arg1: i32) -> (i32, i32, i32, i32) {
    %c0_i32 = arith.constant 0 : i32
    %c0_i32_0 = arith.constant 0 : i32
    %c0_i32_1 = arith.constant 0 : i32
    return %arg0, %arg1, %c0_i32, %c0_i32_0 : i32, i32, i32, i32
  }
  func.func @transform_1(%arg0: i32, %arg1: i32) -> (i32, i32) {
    %c0_i32 = arith.constant 0 : i32
    %c0_i32_0 = arith.constant 0 : i32
    %c0_i32_1 = arith.constant 0 : i32
    return %c0_i32, %c0_i32_0 : i32, i32
  }
  func.func @transform_2(%arg0: i32, %arg1: i32) -> (i32, i32) {
    %c0_i32 = arith.constant 0 : i32
    %c0_i32_0 = arith.constant 0 : i32
    %c0_i32_1 = arith.constant 0 : i32
    return %c0_i32, %c0_i32_0 : i32, i32
  }
  func.func @transform_3(%arg0: i32, %arg1: i32) -> (i32, i32, i32, i32) {
    %c0_i32 = arith.constant 0 : i32
    %c0_i32_0 = arith.constant 0 : i32
    %c0_i32_1 = arith.constant 0 : i32
    return %arg0, %arg1, %c0_i32, %c0_i32_0 : i32, i32, i32, i32
  }
}

module attributes {stable_mosaic.version = 11 : i64} {
  func.func @_apply_kernel(%arg0: i32, %arg1: i32, %arg2: memref<1x1x16x128xbf16, #tpu.memory_space<vmem>>, %arg3: memref<8x64xf32, #tpu.memory_space<vmem>>, %arg4: memref<1x128xf32, #tpu.memory_space<vmem>>, %arg5: memref<12x1xf32, #tpu.memory_space<vmem>>, %arg6: memref<12x1xf32, #tpu.memory_space<vmem>>, %arg7: memref<12x1xf32, #tpu.memory_space<vmem>>, %arg8: memref<1x1x12x128xf32, #tpu.memory_space<vmem>>, %arg9: memref<16x16xf32, #tpu.memory_space<vmem>>) attributes {dimension_semantics = [#tpu.dimension_semantics<parallel>, #tpu.dimension_semantics<arbitrary>], iteration_bounds = array<i64: 2, 2>, scalar_prefetch = 0 : i64, scratch_operands = 1 : i64, tpu.core_type = #tpu.core_type<tc>, window_params = [{transform_indices = @transform_0, window_bounds = array<i64: 1, 1, 16, 128>}, {pipeline_mode = #tpu.pipeline_mode<synchronous>, transform_indices = @transform_1, window_bounds = array<i64: 8, 64>}, {pipeline_mode = #tpu.pipeline_mode<synchronous>, transform_indices = @transform_2, window_bounds = array<i64: 1, 128>}, {pipeline_mode = #tpu.pipeline_mode<synchronous>, transform_indices = @transform_3, window_bounds = array<i64: 12, 1>}, {pipeline_mode = #tpu.pipeline_mode<synchronous>, transform_indices = @transform_4, window_bounds = array<i64: 12, 1>}, {pipeline_mode = #tpu.pipeline_mode<synchronous>, transform_indices = @transform_5, window_bounds = array<i64: 12, 1>}, {transform_indices = @transform_6, window_bounds = array<i64: 1, 1, 12, 128>}]} {
    %c0_i32 = arith.constant 0 : i32
    %0 = arith.cmpi eq, %arg1, %c0_i32 : i32
    %1 = arith.extui %0 : i1 to i32
    %c0_i32_0 = arith.constant 0 : i32
    %2 = arith.cmpi ne, %1, %c0_i32_0 : i32
    scf.if %2 {
      %cst_29 = arith.constant 0.000000e+00 : f32
      %65 = vector.broadcast %cst_29 : f32 to vector<16x16xf32>
      %c0_30 = arith.constant 0 : index
      %c0_31 = arith.constant 0 : index
      %66 = vector.load %arg9[%c0_30, %c0_31] : memref<16x16xf32, #tpu.memory_space<vmem>>, vector<16x16xf32>
      tpu.vector_store %arg9[%c0_30, %c0_31], %65 {strides = array<i32>} : memref<16x16xf32, #tpu.memory_space<vmem>>, vector<16x16xf32>,
    } else {
    }
    %c0 = arith.constant 0 : index
    %c0_1 = arith.constant 0 : index
    %c0_2 = arith.constant 0 : index
    %c0_3 = arith.constant 0 : index
    %3 = vector.load %arg2[%c0, %c0_1, %c0_2, %c0_3] : memref<1x1x16x128xbf16, #tpu.memory_space<vmem>>, vector<1x1x16x128xbf16>
    %4 = vector.shape_cast %3 : vector<1x1x16x128xbf16> to vector<16x128xbf16>
    %5 = arith.extf %4 : vector<16x128xbf16> to vector<16x128xf32>
    %c0_4 = arith.constant 0 : index
    %c0_5 = arith.constant 0 : index
    %6 = vector.load %arg9[%c0_4, %c0_5] : memref<16x16xf32, #tpu.memory_space<vmem>>, vector<16x16xf32>
    %c0_6 = arith.constant 0 : index
    %c0_7 = arith.constant 0 : index
    %7 = vector.load %arg3[%c0_6, %c0_7] : memref<8x64xf32, #tpu.memory_space<vmem>>, vector<8x64xf32>
    %c0_8 = arith.constant 0 : index
    %c0_9 = arith.constant 0 : index
    %8 = vector.load %arg4[%c0_8, %c0_9] : memref<1x128xf32, #tpu.memory_space<vmem>>, vector<1x128xf32>
    %9 = vector.extract_strided_slice %5 {offsets = [0, 0], sizes = [16, 112], strides = [1, 1]} : vector<16x128xf32> to vector<16x112xf32>
    %10 = tpu.concatenate %6, %9 in 1 : vector<16x16xf32>, vector<16x112xf32> -> vector<16x128xf32>
    %cst = arith.constant 0.000000e+00 : f32
    %11 = vector.broadcast %cst : f32 to vector<16x1xf32>
    %12 = vector.extract_strided_slice %5 {offsets = [0, 0], sizes = [16, 127], strides = [1, 1]} : vector<16x128xf32> to vector<16x127xf32>
    %13 = tpu.concatenate %11, %12 in 1 : vector<16x1xf32>, vector<16x127xf32> -> vector<16x128xf32>
    %14 = vector.broadcast %8 : vector<1x128xf32> to vector<16x128xf32>
    %15 = arith.mulf %13, %14 : vector<16x128xf32>
    %cst_10 = arith.constant 0.000000e+00 : f32
    %16 = vector.broadcast %cst_10 : f32 to vector<16x1xf32>
    %17 = vector.extract_strided_slice %10 {offsets = [0, 0], sizes = [16, 127], strides = [1, 1]} : vector<16x128xf32> to vector<16x127xf32>
    %18 = tpu.concatenate %16, %17 in 1 : vector<16x1xf32>, vector<16x127xf32> -> vector<16x128xf32>
    %19 = vector.broadcast %8 : vector<1x128xf32> to vector<16x128xf32>
    %20 = arith.mulf %18, %19 : vector<16x128xf32>
    %21 = tpu.concatenate %20, %10, %15, %5 in 0 : vector<16x128xf32>, vector<16x128xf32>, vector<16x128xf32>, vector<16x128xf32> -> vector<64x128xf32>
    %cst_11 = arith.constant dense<0.000000e+00> : vector<8x128xf32>
    %22 = tpu.matmul %7, %21, %cst_11 {dimension_numbers = #tpu.dot_dimension_numbers<[1], [0], [0], [1], [0, 0, 1, 1], [], []>} : vector<8x64xf32>, vector<64x128xf32>, vector<8x128xf32> -> vector<8x128xf32>
    %23 = vector.extract_strided_slice %5 {offsets = [0, 0], sizes = [4, 128], strides = [1, 1]} : vector<16x128xf32> to vector<4x128xf32>
    %24 = vector.extract_strided_slice %5 {offsets = [4, 0], sizes = [4, 128], strides = [1, 1]} : vector<16x128xf32> to vector<4x128xf32>
    %25 = arith.maximumf %23, %24 : vector<4x128xf32>
    %26 = vector.extract_strided_slice %5 {offsets = [8, 0], sizes = [4, 128], strides = [1, 1]} : vector<16x128xf32> to vector<4x128xf32>
    %27 = vector.extract_strided_slice %5 {offsets = [12, 0], sizes = [4, 128], strides = [1, 1]} : vector<16x128xf32> to vector<4x128xf32>
    %28 = arith.maximumf %26, %27 : vector<4x128xf32>
    %29 = arith.maximumf %25, %28 : vector<4x128xf32>
    %30 = vector.extract_strided_slice %5 {offsets = [0, 112], sizes = [16, 16], strides = [1, 1]} : vector<16x128xf32> to vector<16x16xf32>
    %c0_12 = arith.constant 0 : index
    %c0_13 = arith.constant 0 : index
    %31 = vector.load %arg9[%c0_12, %c0_13] : memref<16x16xf32, #tpu.memory_space<vmem>>, vector<16x16xf32>
    tpu.vector_store %arg9[%c0_12, %c0_13], %30 {strides = array<i32>} : memref<16x16xf32, #tpu.memory_space<vmem>>, vector<16x16xf32>,
    %c0_14 = arith.constant 0 : index
    %c0_15 = arith.constant 0 : index
    %32 = vector.load %arg5[%c0_14, %c0_15] : memref<12x1xf32, #tpu.memory_space<vmem>>, vector<12x1xf32>
    %c0_16 = arith.constant 0 : index
    %c0_17 = arith.constant 0 : index
    %33 = vector.load %arg6[%c0_16, %c0_17] : memref<12x1xf32, #tpu.memory_space<vmem>>, vector<12x1xf32>
    %c0_18 = arith.constant 0 : index
    %c0_19 = arith.constant 0 : index
    %34 = vector.load %arg7[%c0_18, %c0_19] : memref<12x1xf32, #tpu.memory_space<vmem>>, vector<12x1xf32>
    %35 = vector.extract_strided_slice %32 {offsets = [0, 0], sizes = [4, 1], strides = [1, 1]} : vector<12x1xf32> to vector<4x1xf32>
    %36 = vector.broadcast %35 : vector<4x1xf32> to vector<4x128xf32>
    %37 = arith.mulf %29, %36 : vector<4x128xf32>
    %38 = vector.extract_strided_slice %33 {offsets = [0, 0], sizes = [4, 1], strides = [1, 1]} : vector<12x1xf32> to vector<4x1xf32>
    %39 = vector.broadcast %38 : vector<4x1xf32> to vector<4x128xf32>
    %40 = arith.addf %37, %39 : vector<4x128xf32>
    %41 = vector.extract_strided_slice %32 {offsets = [4, 0], sizes = [8, 1], strides = [1, 1]} : vector<12x1xf32> to vector<8x1xf32>
    %42 = vector.broadcast %41 : vector<8x1xf32> to vector<8x128xf32>
    %43 = arith.mulf %22, %42 : vector<8x128xf32>
    %44 = vector.extract_strided_slice %33 {offsets = [4, 0], sizes = [8, 1], strides = [1, 1]} : vector<12x1xf32> to vector<8x1xf32>
    %45 = vector.broadcast %44 : vector<8x1xf32> to vector<8x128xf32>
    %46 = arith.addf %43, %45 : vector<8x128xf32>
    %cst_20 = arith.constant 0.000000e+00 : f32
    %47 = vector.broadcast %cst_20 : f32 to vector<4x128xf32>
    %48 = arith.cmpf ogt, %40, %47 : vector<4x128xf32>
    %49 = vector.extract_strided_slice %34 {offsets = [0, 0], sizes = [4, 1], strides = [1, 1]} : vector<12x1xf32> to vector<4x1xf32>
    %50 = vector.broadcast %49 : vector<4x1xf32> to vector<4x128xf32>
    %51 = arith.mulf %50, %40 : vector<4x128xf32>
    %52 = arith.select %48, %40, %51 : vector<4x128xi1>, vector<4x128xf32>
    %c0_21 = arith.constant 0 : index
    %c0_22 = arith.constant 0 : index
    %c0_23 = arith.constant 0 : index
    %c0_24 = arith.constant 0 : index
    %53 = vector.load %arg8[%c0_21, %c0_22, %c0_23, %c0_24] : memref<1x1x12x128xf32, #tpu.memory_space<vmem>>, vector<1x1x4x128xf32>
    %54 = vector.shape_cast %53 : vector<1x1x4x128xf32> to vector<4x128xf32>
    %55 = vector.shape_cast %52 : vector<4x128xf32> to vector<1x1x4x128xf32>
    tpu.vector_store %arg8[%c0_21, %c0_22, %c0_23, %c0_24], %55 {strides = array<i32>} : memref<1x1x12x128xf32, #tpu.memory_space<vmem>>, vector<1x1x4x128xf32>,
    %cst_25 = arith.constant 0.000000e+00 : f32
    %56 = vector.broadcast %cst_25 : f32 to vector<8x128xf32>
    %57 = arith.cmpf ogt, %46, %56 : vector<8x128xf32>
    %58 = vector.extract_strided_slice %34 {offsets = [4, 0], sizes = [8, 1], strides = [1, 1]} : vector<12x1xf32> to vector<8x1xf32>
    %59 = vector.broadcast %58 : vector<8x1xf32> to vector<8x128xf32>
    %60 = arith.mulf %59, %46 : vector<8x128xf32>
    %61 = arith.select %57, %46, %60 : vector<8x128xi1>, vector<8x128xf32>
    %c0_26 = arith.constant 0 : index
    %c0_27 = arith.constant 0 : index
    %c4 = arith.constant 4 : index
    %c0_28 = arith.constant 0 : index
    %62 = vector.load %arg8[%c0_26, %c0_27, %c4, %c0_28] : memref<1x1x12x128xf32, #tpu.memory_space<vmem>>, vector<1x1x8x128xf32>
    %63 = vector.shape_cast %62 : vector<1x1x8x128xf32> to vector<8x128xf32>
    %64 = vector.shape_cast %61 : vector<8x128xf32> to vector<1x1x8x128xf32>
    tpu.vector_store %arg8[%c0_26, %c0_27, %c4, %c0_28], %64 {strides = array<i32>} : memref<1x1x12x128xf32, #tpu.memory_space<vmem>>, vector<1x1x8x128xf32>,
    return
  }
  func.func @transform_0(%arg0: i32, %arg1: i32) -> (i32, i32, i32, i32) {
    %c0_i32 = arith.constant 0 : i32
    %c0_i32_0 = arith.constant 0 : i32
    %c0_i32_1 = arith.constant 0 : i32
    return %arg0, %arg1, %c0_i32, %c0_i32_0 : i32, i32, i32, i32
  }
  func.func @transform_1(%arg0: i32, %arg1: i32) -> (i32, i32) {
    %c0_i32 = arith.constant 0 : i32
    %c0_i32_0 = arith.constant 0 : i32
    %c0_i32_1 = arith.constant 0 : i32
    return %c0_i32, %c0_i32_0 : i32, i32
  }
  func.func @transform_2(%arg0: i32, %arg1: i32) -> (i32, i32) {
    %c0_i32 = arith.constant 0 : i32
    %c0_i32_0 = arith.constant 0 : i32
    %c0_i32_1 = arith.constant 0 : i32
    return %c0_i32, %c0_i32_0 : i32, i32
  }
  func.func @transform_3(%arg0: i32, %arg1: i32) -> (i32, i32) {
    %c0_i32 = arith.constant 0 : i32
    %c0_i32_0 = arith.constant 0 : i32
    %c0_i32_1 = arith.constant 0 : i32
    return %c0_i32, %c0_i32_0 : i32, i32
  }
  func.func @transform_4(%arg0: i32, %arg1: i32) -> (i32, i32) {
    %c0_i32 = arith.constant 0 : i32
    %c0_i32_0 = arith.constant 0 : i32
    %c0_i32_1 = arith.constant 0 : i32
    return %c0_i32, %c0_i32_0 : i32, i32
  }
  func.func @transform_5(%arg0: i32, %arg1: i32) -> (i32, i32) {
    %c0_i32 = arith.constant 0 : i32
    %c0_i32_0 = arith.constant 0 : i32
    %c0_i32_1 = arith.constant 0 : i32
    return %c0_i32, %c0_i32_0 : i32, i32
  }
  func.func @transform_6(%arg0: i32, %arg1: i32) -> (i32, i32, i32, i32) {
    %c0_i32 = arith.constant 0 : i32
    %c0_i32_0 = arith.constant 0 : i32
    %c0_i32_1 = arith.constant 0 : i32
    return %arg0, %arg1, %c0_i32, %c0_i32_0 : i32, i32, i32, i32
  }
}

</mosaic_0001>

<bundles_post_ra>
// kernel: downsampler_forward.2
= control target key start
LH: loop header
LB: loop body
LE: loop exit
PB: predicated region body
PF: predicated region fallthrough
CT: control target
= control target key end

     0   :  { %s641_s12 = smov 0   ;;  %s643_s13 = smov 0   ;;  %s708_s0 = inlined_call_operand.vmem [shape: bf16[2,2,16,128], index: 0, kind: input, shape index: {}]   ;;  %s709_s1 = inlined_call_operand.vmem [shape: f32[8,64], index: 1, kind: input, shape index: {}]   ;;  %s710_s2 = inlined_call_operand.vmem [shape: f32[1,128], index: 2, kind: input, shape index: {}]   ;;  %s711_s3 = inlined_call_operand.vmem [shape: f32[2,2,12,2], index: 3, kind: output, shape index: {}]  }
   0x1   :  { %s645_s14 = smov 0   ;;  %s647_s15 = smov 0  }
   0x2   :  { %s649_s16 = smov 0  }
   0x3 LB: > { %s22_s17 = sadd.s32 1, %s605_s14  ;;  %s25_s18 = sadd.s32 1, %s609_s15  ;;  %s613_s16 = sphi %s649_s16, %s13_s16   ;;  %s609_s15 = sphi %s647_s15, %s715_s15   ;;  %s605_s14 = sphi %s645_s14, %s714_s14   ;;  %s601_s13 = sphi %s643_s13, %s713_s13   ;;  %s597_s12 = sphi %s641_s12, %s712_s12  }
   0x4   : > { %p23_p0 = scmp.ge.s32.totalorder %s22_s17, 2  ;;  %p463_p1 = scmp.ge.s32.totalorder %s613_s16, 1 }
   0x5   : > { %p157_p2 = scmp.lt.s32.totalorder %s613_s16, 5 }
   0x6   : > { %s717_s17 = smov (%p23_p0, %s22_s17), 0  ;;  %s719_s18 = smov (!%p23_p0, %s25_s18), %s609_s15 }
   0x7   : > { %p158_p3 = pnand %p463_p1, %p157_p2  ;;  %p27_p4 = scmp.ge.s32.totalorder %s719_s18, 2 }
   0x8   : > { %p189_p5 = scmp.lt.s32.totalorder (!%p158_p3), %s601_s13, 1  ;;  %p191_p6 = scmp.lt.s32.totalorder (!%p158_p3), %s597_s12, 1 }
   0x9   : > { %s721_s18 = smov (%p27_p4, %s719_s18), 0  ;;  %161 = sbr.rel (%p158_p3) target bundleno = 641 (0x281), region = 32 }
   0xa   : > { %p470_p7 = scmp.ne.s32.totalorder (!%p158_p3), %s597_s12, 0 }
  0x10   : > { %s723_s13 = smov (!%p189_p5, %s601_s13), 1  ;;  %210 = sbr.rel (%p470_p7) target bundleno = 23 (0x17), region = 36 }
  0x11   : > { %s192_s19 = scalar_select %p191_p6, %s597_s12, 1 }
  0x12   : > { %s465_s20 = sshll.u32 %s723_s13, 2  ;;  %vm211_vm0 = vcmask (!%p470_p7), 130048   ;;  %v615_v0 = vmov (!%p470_p7), 0.0  }
  0x13   : > { %s464_s21 = sshll.u32 %s192_s19, 1  ;;  %212 = vst.msk [vmem:[#allocation2] sm:$0xff] (!%p470_p7), %vm211_vm0, %v615_v0  ;;  %213 = vst.msk [vmem:[#allocation2 + $0x8] sm:$0xff] (!%p470_p7), %vm211_vm0, %v615_v0 }
  0x14   : > { %s195_s22 = sadd.s32 %s465_s20, %s464_s21 }
  0x15   : > { %s466_s23 = sshll.u32 %s195_s22, 2  ;;  %s469_s24 = sshll.u32 %s195_s22, 3 }
  0x16   : > { %s197_s27 = scalar_lea.vmem %s708_s0, %s466_s23  ;;  %s677_s30 = scalar_lea.vmem %s711_s3, %s469_s24 }
  0x17 PF: > { %v476_v1 = vld [vmem:[%s197_s27] sm:$0xff]   ;;  %s616_s4 = smov 16   ;;  %v617_v5 = vmov 0.0|0.0   ;;  %vm230_vm1 = vcmask 130048   ;;  %s618_s5 = smov 1   ;;  %vm619_vm2 = vmmov 0  }
  0x18   : > { %v477_v2 = vunpack.c.l.bf16 %v476_v1  ;;  %v478_v3 = vunpack.c.h.bf16 %v476_v1  ;;  %507 = vmatprep.subr.bf16.mxu0 %v617_v5  ;;  %v620_v14 = vmov 0.0   ;;  %vm345_vm3 = vcmask 1043456   ;;  %v471_v23 = vld [vmem:[%s710_s2] ss:$0 sm:$0xff] }
  0x19   : > { %504 = vmatprep.mubr.msk.f32.mxu0 %vm619_vm2, %v620_v14  ;;  %vm239_vm4 = vcmask 7168   ;;  %v220_v39 = vld [vmem:[%s709_s1] sm:$0xff]  ;;  %vm262_vm5 = vcmask 523264   ;;  %vm354_vm6 = vcmask 11264   ;;  %vm362_vm7 = vcmask 15360  }
  0x1a   : > { %v565_v4 = vpack.i.bf16 %v478_v3, %v477_v2  ;;  %v218_v7 = vld [vmem:[#allocation2] sm:$0xff]  ;;  %v219_v8 = vld [vmem:[#allocation2 + $0x8] sm:$0xff]  ;;  %v336_v15 = vrot.slane %v477_v2, 4  ;;  %v339_v16 = vrot.slane %v478_v3, 4 }
  0x1c   : > { %566 = vrot.lane.b32.xlu0 %v565_v4, %s616_s4  ;;  %v338_v17 = vmax.f32 %v477_v2, %v336_v15  ;;  %v341_v18 = vmax.f32 %v478_v3, %v339_v16 }
  0x1e   : > { %v342_v19 = vmax.f32 %v338_v17, %v341_v18 }
  0x20   : > { %v346_v20 = vsel %vm345_vm3, %v342_v19, 0.0  ;;  %v349_v21 = vmul.f32 %v342_v19, %v342_v19 }
  0x22   : > { %v350_v22 = vsel %vm345_vm3, %v349_v21, 0.0 }
  0x8e   : > { %v567_v6 = vpop.permute.xlu0 %566 }
  0x8f   : > { %v569_v9 = vunpack.i.h.bf16 %v567_v6  ;;  %v568_v10 = vunpack.i.l.bf16 %v567_v6 }
  0x91   : > { %v232_v11 = vsel %vm230_vm1, %v219_v8, %v569_v9  ;;  %344 = vst.msk [vmem:[#allocation2 + $0x8] sm:$0xff] %vm230_vm1, %v569_v9  ;;  %v231_v12 = vsel %vm230_vm1, %v218_v7, %v568_v10  ;;  %343 = vst.msk [vmem:[#allocation2] sm:$0xff] %vm230_vm1, %v568_v10 }
  0x92   : > { %254 = vrot.lane.b32.xlu1 %v232_v11, %s618_s5  ;;  %v511_v13 = vpack.c.bf16 %v232_v11, %v231_v12  ;;  %252 = vrot.lane.b32.xlu0 %v231_v12, %s618_s5 }
  0x96   : > { %571 = vrot.lane.b32.xlu1 %v565_v4, %s618_s5 }
  0xb1   : > { %347 = vadd.xlane.f32.xlu0 %v346_v20 }
  0xba   : > { %351 = vadd.xlane.f32.xlu1 %v350_v22 }
 0x104   : > { %v255_v24 = vpop.permute.xlu1 %254  ;;  %v253_v25 = vpop.permute.xlu0 %252 }
 0x105   : > { %v259_v26 = vsel %vm239_vm4, 0.0, %v255_v24  ;;  %v258_v27 = vsel %vm239_vm4, 0.0, %v253_v25 }
 0x106   : > { %v261_v28 = vmul.f32 %v471_v23, %v259_v26  ;;  %v260_v29 = vmul.f32 %v471_v23, %v258_v27 }
 0x108   : > { %v572_v30 = vpop.permute.xlu1 %571  ;;  %v508_v31 = vpack.c.bf16 %v261_v28, %v260_v29 }
 0x109   : > { %v574_v32 = vunpack.i.h.bf16 %v572_v30  ;;  %v573_v33 = vunpack.i.l.bf16 %v572_v30 }
 0x10a   : > { %509 = vmatpush3.bf16.msra.mxu0 %v508_v31 }
 0x10b   : > { %v241_v34 = vsel %vm239_vm4, 0.0, %v574_v32  ;;  %v240_v35 = vsel %vm239_vm4, 0.0, %v573_v33  ;;  %510 = vmatprep.subr.bf16.mxu0 %v617_v5 }
 0x10c   : > { %v249_v36 = vmul.f32 %v471_v23, %v241_v34  ;;  %v248_v37 = vmul.f32 %v471_v23, %v240_v35 }
 0x10e   : > { %512 = vmatpush3.bf16.msra.mxu0 %v511_v13  ;;  %v514_v38 = vpack.c.bf16 %v249_v36, %v248_v37 }
 0x10f   : > { %513 = vmatprep.subr.bf16.mxu0 %v617_v5 }
 0x112   : > { %515 = vmatpush3.bf16.msra.mxu0 %v514_v38 }
 0x113   : > { %516 = vmatprep.subr.bf16.mxu0 %v617_v5 }
 0x116   : > { %518 = vmatpush3.bf16.msra.mxu0 %v476_v1 }
 0x119   : > { %505 = vmatmul.mubr.msk.f32.vlgmr.msra.gmra.mrb[0].mxu0 %vm262_vm5, %v220_v39 }
 0x13e   : > { %v348_v41 = vpop.xlane.xlu0 %347 }
 0x147   : > { %v352_v40 = vpop.xlane.xlu1 %351 }
 0x148   : > { %v353_v42 = vsel %vm239_vm4, %v348_v41, %v352_v40 }
 0x149   : > { %355 = vst.msk [vmem:[%s677_s30] sm:$0xf] %vm354_vm6, %v353_v42 }
 0x1ec   : > { %v332_v43 = vpop.f32.mrb[0].mxu0 }
 0x1ed   : > { %v506_v44 = vpop.f32.mrb[1].mxu0  ;;  %356 = vadd.xlane.f32.xlu0 %v332_v43  ;;  %v358_v45 = vmul.f32 %v332_v43, %v332_v43 }
 0x1f1   : > { %359 = vadd.xlane.f32.xlu0 %v358_v45 }
 0x27a   : > { %v357_v46 = vpop.xlane.xlu0 %356 }
 0x27e   : > { %v360_v47 = vpop.xlane.xlu0 %359 }
 0x27f   : > { %v361_v48 = vsel %vm239_vm4, %v357_v46, %v360_v47 }
 0x280   : > { %363 = vst.msk [vmem:[%s677_s30 + $0x4] sm:$0xff] %vm362_vm7, %v361_v48 }
 0x281 PF: > { %s13_s16 = sadd.s32 1, %s613_s16   ;;  %s712_s12 = smov %s605_s14 }
 0x282   : > { %p10_p8 = scmp.ge.s32.totalorder %s13_s16, 6   ;;  %s713_s13 = smov %s609_s15 }
 0x283   : > { %s714_s14 = smov %s717_s17  ;;  %s715_s15 = smov %s721_s18 }
 0x284   :  { %12 = sbr.rel (!%p10_p8) target bundleno = 3 (0x3), region = 66 }

// kernel: downsampler_forward.3
= control target key start
LH: loop header
LB: loop body
LE: loop exit
PB: predicated region body
PF: predicated region fallthrough
CT: control target
= control target key end

     0   :  { %s787_s21 = smov 0   ;;  %s789_s22 = smov 0   ;;  %s884_s0 = inlined_call_operand.vmem [shape: bf16[2,2,16,128], index: 0, kind: input, shape index: {}]   ;;  %s885_s1 = inlined_call_operand.vmem [shape: f32[8,64], index: 1, kind: input, shape index: {}]   ;;  %s886_s2 = inlined_call_operand.vmem [shape: f32[1,128], index: 2, kind: input, shape index: {}]   ;;  %s887_s3 = inlined_call_operand.vmem [shape: f32[12,1], index: 3, kind: input, shape index: {}]   ;;  %s888_s4 = inlined_call_operand.vmem [shape: f32[12,1], index: 4, kind: input, shape index: {}]   ;;  %s889_s5 = inlined_call_operand.vmem [shape: f32[12,1], index: 5, kind: input, shape index: {}]   ;;  %s890_s6 = inlined_call_operand.vmem [shape: f32[2,2,12,128], index: 6, kind: output, shape index: {}]  }
   0x1   :  { %s791_s23 = smov 0   ;;  %s793_s24 = smov 0  }
   0x2   :  { %s795_s25 = smov 0  }
   0x3 LB: > { %s25_s26 = sadd.s32 1, %s735_s23  ;;  %s28_s27 = sadd.s32 1, %s739_s24  ;;  %s743_s25 = sphi %s795_s25, %s16_s25   ;;  %s739_s24 = sphi %s793_s24, %s894_s24   ;;  %s735_s23 = sphi %s791_s23, %s893_s23   ;;  %s731_s22 = sphi %s789_s22, %s892_s22   ;;  %s727_s21 = sphi %s787_s21, %s891_s21  }
   0x4   : > { %p26_p0 = scmp.ge.s32.totalorder %s25_s26, 2  ;;  %p590_p1 = scmp.ge.s32.totalorder %s743_s25, 1 }
   0x5   : > { %p232_p2 = scmp.lt.s32.totalorder %s743_s25, 5 }
   0x6   : > { %s896_s26 = smov (%p26_p0, %s25_s26), 0  ;;  %s898_s27 = smov (!%p26_p0, %s28_s27), %s739_s24 }
   0x7   : > { %p233_p3 = pnand %p590_p1, %p232_p2  ;;  %p30_p4 = scmp.ge.s32.totalorder %s898_s27, 2 }
   0x8   : > { %p270_p5 = scmp.lt.s32.totalorder (!%p233_p3), %s731_s22, 1  ;;  %p272_p6 = scmp.lt.s32.totalorder (!%p233_p3), %s727_s21, 1 }
   0x9   : > { %s900_s27 = smov (%p30_p4, %s898_s27), 0  ;;  %236 = sbr.rel (%p233_p3) target bundleno = 506 (0x1fa), region = 44 }
   0xa   : > { %p597_p7 = scmp.ne.s32.totalorder (!%p233_p3), %s727_s21, 0 }
  0x10   : > { %s902_s22 = smov (!%p270_p5, %s731_s22), 1  ;;  %291 = sbr.rel (%p597_p7) target bundleno = 23 (0x17), region = 48 }
  0x11   : > { %s273_s28 = scalar_select %p272_p6, %s727_s21, 1 }
  0x12   : > { %s592_s29 = sshll.u32 %s902_s22, 2  ;;  %vm292_vm0 = vcmask (!%p597_p7), 130048   ;;  %v745_v0 = vmov (!%p597_p7), 0.0  }
  0x13   : > { %s591_s30 = sshll.u32 %s273_s28, 1  ;;  %293 = vst.msk [vmem:[#allocation2] sm:$0xff] (!%p597_p7), %vm292_vm0, %v745_v0  ;;  %294 = vst.msk [vmem:[#allocation2 + $0x8] sm:$0xff] (!%p597_p7), %vm292_vm0, %v745_v0 }
  0x14   : > { %s276_s7 = sadd.s32 %s592_s29, %s591_s30 }
  0x15   : > { %s593_s8 = sshll.u32 %s276_s7, 2  ;;  %s596_s9 = sshll.u32 %s276_s7, 3 }
  0x16   : > { %s278_s12 = scalar_lea.vmem %s884_s0, %s593_s8  ;;  %s823_s15 = scalar_lea.vmem %s890_s6, %s596_s9 }
  0x17 PF: > { %v825_v1 = vld [vmem:[%s278_s12] sm:$0xff]   ;;  %s746_s16 = smov 16   ;;  %v747_v5 = vmov 0.0|0.0   ;;  %vm311_vm1 = vcmask 130048   ;;  %s748_s17 = smov 1   ;;  %vm749_vm2 = vmmov 0  }
  0x18   : > { %v828_v2 = vunpack.c.l.bf16 %v825_v1  ;;  %v831_v3 = vunpack.c.h.bf16 %v825_v1  ;;  %634 = vmatprep.subr.bf16.mxu0 %v747_v5  ;;  %v750_v14 = vmov 0.0   ;;  %v427_v15 = vld [vmem:[%s887_s3 + $0x8] sm:$0xf]  ;;  %v426_v16 = vld [vmem:[%s887_s3] sm:$0xff]  ;;  %v751_v17 = vmov 0  }
  0x19   : > { %631 = vmatprep.mubr.msk.f32.mxu0 %vm749_vm2, %v750_v14  ;;  %704 = vset.pattern.permute.xlu1 %v751_v17  ;;  %v428_v18 = vld [vmem:[%s888_s4] sm:$0xff]  ;;  %v429_v19 = vld [vmem:[%s888_s4 + $0x8] sm:$0xf]  ;;  %vm320_vm3 = vcmask 7168   ;;  %vm343_vm4 = vcmask 523264   ;;  %vm448_vm6 = vcmask 1043456  }
  0x1a   : > { %v693_v4 = vpack.i.bf16 %v831_v3, %v828_v2  ;;  %v299_v7 = vld [vmem:[#allocation2] sm:$0xff]  ;;  %v300_v8 = vld [vmem:[#allocation2 + $0x8] sm:$0xff]  ;;  %703 = vset.pattern.permute.xlu0 %v751_v17  ;;  %v420_v38 = vrot.slane %v831_v3, 4  ;;  %v417_v39 = vrot.slane %v828_v2, 4 }
  0x1b   : > { %v430_v20 = vld [vmem:[%s889_s5] sm:$0xff]  ;;  %v431_v21 = vld [vmem:[%s889_s5 + $0x8] sm:$0xf] }
  0x1c   : > { %694 = vrot.lane.b32.xlu0 %v693_v4, %s746_s16  ;;  %v598_v22 = vld [vmem:[%s886_s2] ss:$0 sm:$0xff]  ;;  %v422_v40 = vmax.f32 %v831_v3, %v420_v38  ;;  %v419_v41 = vmax.f32 %v828_v2, %v417_v39 }
  0x1d   : > { %v301_v42 = vld [vmem:[%s885_s1] sm:$0xff] }
  0x1e   : > { %v423_v43 = vmax.f32 %v419_v41, %v422_v40 }
  0x8e   : > { %v695_v6 = vpop.permute.xlu0 %694 }
  0x8f   : > { %v697_v9 = vunpack.i.h.bf16 %v695_v6  ;;  %v696_v10 = vunpack.i.l.bf16 %v695_v6 }
  0x91   : > { %v313_v11 = vsel %vm311_vm1, %v300_v8, %v697_v9  ;;  %425 = vst.msk [vmem:[#allocation2 + $0x8] sm:$0xff] %vm311_vm1, %v697_v9  ;;  %v312_v12 = vsel %vm311_vm1, %v299_v7, %v696_v10  ;;  %424 = vst.msk [vmem:[#allocation2] sm:$0xff] %vm311_vm1, %v696_v10 }
  0x92   : > { %335 = vrot.lane.b32.xlu1 %v313_v11, %s748_s17  ;;  %v638_v13 = vpack.c.bf16 %v313_v11, %v312_v12  ;;  %333 = vrot.lane.b32.xlu0 %v312_v12, %s748_s17 }
  0x96   : > { %699 = vrot.lane.b32.xlu1 %v693_v4, %s748_s17  ;;  %434 = vperm.xlu0 %703, %v426_v16  }
  0x9a   : > { %446 = vperm.xlu1 %704, %v427_v15   ;;  %456 = vperm.xlu0 %703, %v429_v19  }
  0x9e   : > { %440 = vperm.xlu1 %704, %v428_v18   ;;  %475 = vperm.xlu0 %703, %v431_v21  }
  0xa2   : > { %466 = vperm.xlu1 %704, %v430_v20  }
 0x104   : > { %v336_v23 = vpop.permute.xlu1 %335  ;;  %v334_v24 = vpop.permute.xlu0 %333 }
 0x105   : > { %v340_v25 = vsel %vm320_vm3, 0.0, %v336_v23  ;;  %v339_v26 = vsel %vm320_vm3, 0.0, %v334_v24 }
 0x106   : > { %v342_v27 = vmul.f32 %v598_v22, %v340_v25  ;;  %v341_v28 = vmul.f32 %v598_v22, %v339_v26 }
 0x108   : > { %v700_v29 = vpop.permute.xlu1 %699  ;;  %v635_v30 = vpack.c.bf16 %v342_v27, %v341_v28 }
 0x109   : > { %v702_v31 = vunpack.i.h.bf16 %v700_v29  ;;  %v701_v32 = vunpack.i.l.bf16 %v700_v29 }
 0x10a   : > { %636 = vmatpush3.bf16.msra.mxu0 %v635_v30 }
 0x10b   : > { %v322_v33 = vsel %vm320_vm3, 0.0, %v702_v31  ;;  %v321_v34 = vsel %vm320_vm3, 0.0, %v701_v32  ;;  %637 = vmatprep.subr.bf16.mxu0 %v747_v5 }
 0x10c   : > { %v330_v35 = vmul.f32 %v598_v22, %v322_v33  ;;  %v329_v36 = vmul.f32 %v598_v22, %v321_v34 }
 0x10e   : > { %639 = vmatpush3.bf16.msra.mxu0 %v638_v13  ;;  %v641_v37 = vpack.c.bf16 %v330_v35, %v329_v36 }
 0x10f   : > { %640 = vmatprep.subr.bf16.mxu0 %v747_v5 }
 0x112   : > { %642 = vmatpush3.bf16.msra.mxu0 %v641_v37 }
 0x113   : > { %643 = vmatprep.subr.bf16.mxu0 %v747_v5 }
 0x115   : > { %v435_v45 = vpop.permute.xlu0 %434 }
 0x116   : > { %645 = vmatpush3.bf16.msra.mxu0 %v825_v1  ;;  %v437_v46 = vmul.f32 %v435_v45, %v423_v43  ;;  %v449_v53 = vrot.slane %v435_v45, 4 }
 0x119   : > { %632 = vmatmul.mubr.msk.f32.vlgmr.msra.gmra.mrb[0].mxu0 %vm343_vm4, %v301_v42  ;;  %v447_v44 = vpop.permute.xlu1 %446  ;;  %v457_v55 = vpop.permute.xlu0 %456 }
 0x11a   : > { %v450_v52 = vrot.slane %v447_v44, 4  ;;  %v459_v57 = vrot.slane %v457_v55, 4 }
 0x11c   : > { %v451_v54 = vsel %vm448_vm6, %v449_v53, %v450_v52 }
 0x11d   : > { %v441_v47 = vpop.permute.xlu1 %440  ;;  %v476_v0 = vpop.permute.xlu0 %475 }
 0x11e   : > { %v443_v48 = vadd.f32 %v441_v47, %v437_v46  ;;  %v458_v56 = vrot.slane %v441_v47, 4 }
 0x120   : > { %vm463_vm5 = vcmp.gt.f32.partialorder %v443_v48, 0.0  ;;  %v460_v61 = vsel %vm448_vm6, %v458_v56, %v459_v57 }
 0x121   : > { %v467_v49 = vpop.permute.xlu1 %466 }
 0x122   : > { %v469_v50 = vmul.f32 %v467_v49, %v443_v48 }
 0x124   : > { %v470_v51 = vsel %vm463_vm5, %v443_v48, %v469_v50 }
 0x125   : > { %471 = vst [vmem:[%s823_s15] sm:$0xf] %v470_v51 }
 0x1ec   : > { %v413_v58 = vpop.f32.mrb[0].mxu0 }
 0x1ed   : > { %v453_v59 = vmul.f32 %v451_v54, %v413_v58  ;;  %v633_v60 = vpop.f32.mrb[1].mxu0 }
 0x1ef   : > { %v462_v62 = vadd.f32 %v460_v61, %v453_v59 }
 0x1f1   : > { %v479_v63 = vrot.slane %v462_v62, 4  ;;  %vm472_vm7 = vcmp.gt.f32.partialorder %v462_v62, 0.0 }
 0x1f3   : > { %v481_v1 = vmul.f32 %v479_v63, %v467_v49  ;;  %v482_v2 = vmul.f32 %v479_v63, %v476_v0 }
 0x1f5   : > { %v485_v3 = vrot.slane %v481_v1, 4  ;;  %v486_v4 = vrot.slane %v482_v2, 4 }
 0x1f7   : > { %v487_v5 = vsel %vm448_vm6, %v485_v3, %v486_v4 }
 0x1f8   : > { %v489_v6 = vsel %vm472_vm7, %v462_v62, %v487_v5 }
 0x1f9   : > { %490 = vst [vmem:[%s823_s15 + $0x4] sm:$0xff] %v489_v6 }
 0x1fa PF: > { %s16_s25 = sadd.s32 1, %s743_s25   ;;  %s891_s21 = smov %s735_s23 }
 0x1fb   : > { %p13_p8 = scmp.ge.s32.totalorder %s16_s25, 6   ;;  %s892_s22 = smov %s739_s24 }
 0x1fc   : > { %s893_s23 = smov %s896_s26  ;;  %s894_s24 = smov %s900_s27 }
 0x1fd   :  { %15 = sbr.rel (!%p13_p8) target bundleno = 3 (0x3), region = 78 }

</bundles_post_ra>
